<compile_context>
chip_gen: v6e
topology: v6e:2x2x1
jax: 0.10.0
libtpu: 0.0.40
codegen_flags: <defaults>
</compile_context>

<pallas_src>
import functools

import jax
import jax.numpy as jnp
import numpy as np
from jax import lax
from jax.experimental import pallas as pl
from jax.experimental.pallas import tpu as pltpu


def _compute_vmem_limit() -> int:
    """Generation-aware scoped-VMEM budget.

    v5e/v6e have 128 MiB physical VMEM -> allow ~96 MiB (the 32 MiB scoped
    default is NOT the hardware limit); v7x has 64 MiB -> stay near ~48 MiB.
    """
    try:
        cap = int(pltpu.get_tpu_info().vmem_capacity_bytes)
    except Exception:  # off-TPU / API drift: fall back to the v7x-safe budget
        cap = 64 * 1024 * 1024
    return max(32 * 1024 * 1024, min(100 * 1024 * 1024, (cap * 3) // 4))


_VMEM_LIMIT = _compute_vmem_limit()


def _pick_tile(dim: int, target: int, align: int) -> int:
    """Largest `align`-multiple divisor of `dim` that is <= target, else full dim."""
    # TODO(synk): for awkward (prime-ish) dims switch to pl.cdiv grids with a
    # padded/masked remainder tile instead of the full-dimension fallback.
    if dim <= target:
        return dim
    t = (target // align) * align
    while t >= align:
        if dim % t == 0:
            return t
        t -= align
    return dim


# ----------------------------------------------------------------------------
# Tiled linear:  (M, K) @ (K, N) + b  with K-axis accumulation (used for w_o)
# ----------------------------------------------------------------------------
def _linear_kernel(x_ref, w_ref, b_ref, o_ref, acc_ref):
    kk = pl.program_id(2)

    @pl.when(kk == 0)
    def _():
        acc_ref[...] = jnp.zeros_like(acc_ref)

    acc_ref[...] += jnp.dot(x_ref[...], w_ref[...],
                            preferred_element_type=jnp.float32)

    @pl.when(kk == pl.num_programs(2) - 1)
    def _():
        o_ref[...] = (acc_ref[...] + b_ref[...]).astype(o_ref.dtype)


def linear(x2d, w, b, *, tm_target=256, tn_target=512, tk_target=1024,
           out_dtype=None):
    """x2d: (M, K) @ w: (K, N) + b: (1, N) -> (M, N) in `out_dtype`.

    Weights/bias arrive pre-transposed and pre-cast (prepare_params).  f32
    accumulation in VMEM scratch; large K/N tiles (v5e is memory-bound on the
    projections, fewer/larger tiles cut re-streaming + per-step overhead).
    """
    M, K = x2d.shape
    K2, N = w.shape
    assert K == K2
    if out_dtype is None:
        out_dtype = x2d.dtype
    tm = _pick_tile(M, tm_target, 8)
    tn = _pick_tile(N, tn_target, 128)
    tk = _pick_tile(K, tk_target, 128)
    grid = (M // tm, N // tn, K // tk)
    ib = jnp.dtype(x2d.dtype).itemsize
    ob = jnp.dtype(out_dtype).itemsize
    cost = pl.CostEstimate(
        flops=2 * M * N * K,
        transcendentals=0,
        bytes_accessed=(M * K + K * N) * ib + M * N * ob + N * 4,
    )
    return pl.pallas_call(
        _linear_kernel,
        out_shape=jax.ShapeDtypeStruct((M, N), out_dtype),
        grid=grid,
        in_specs=[
            pl.BlockSpec((tm, tk), lambda i, j, kk: (i, kk)),
            pl.BlockSpec((tk, tn), lambda i, j, kk: (kk, j)),
            pl.BlockSpec((1, tn), lambda i, j, kk: (0, j)),
        ],
        out_specs=pl.BlockSpec((tm, tn), lambda i, j, kk: (i, j)),
        scratch_shapes=[pltpu.VMEM((tm, tn), jnp.float32)],
        compiler_params=pltpu.CompilerParams(
            dimension_semantics=("parallel", "parallel", "arbitrary"),
            vmem_limit_bytes=_VMEM_LIMIT,
        ),
        cost_estimate=cost,
    )(x2d, w, b)


# ----------------------------------------------------------------------------
# Head-split linear (Q / K projections):  (B, S, D) -> (B, H, S, dh)
# ----------------------------------------------------------------------------
def _linear_headsplit_kernel(x_ref, w_ref, b_ref, o_ref):
    # x: (1, ts, D)  w: (1, D, dh)  b: (1, 1, dh)  o: (1, 1, ts, dh)
    o_ref[0, 0] = (jnp.dot(x_ref[0], w_ref[0],
                           preferred_element_type=jnp.float32)
                   + b_ref[0]).astype(o_ref.dtype)


def linear_headsplit(x, w_h, b_h, *, ts_target=256, out_dtype=None):
    """x: (B, S, D), w_h: (H, D, dh), b_h: (H, 1, dh) -> (B, H, S, dh).

    The per-head column split of the projection is folded into the output
    BlockSpec so attention receives head-contiguous (S, dh) tiles straight
    from DMA (no in-kernel lane slicing, no HBM head transpose).  The head
    axis is innermost and the x tile's index_map ignores it, so Pallas keeps
    the resident x block across heads instead of re-DMAing it.
    """
    # TODO(synk): K-tile over D (with an f32 accumulator) if d_model grows
    # beyond a few K and the (ts, D) x block no longer fits comfortably.
    B, S, D = x.shape
    H, D2, dh = w_h.shape
    assert D == D2
    if out_dtype is None:
        out_dtype = x.dtype
    ts = _pick_tile(S, ts_target, 8)
    grid = (B, S // ts, H)
    ib = jnp.dtype(x.dtype).itemsize
    ob = jnp.dtype(out_dtype).itemsize
    cost = pl.CostEstimate(
        flops=2 * B * S * D * H * dh,
        transcendentals=0,
        bytes_accessed=B * S * D * ib + H * D * dh * ib + B * H * S * dh * ob,
    )
    return pl.pallas_call(
        _linear_headsplit_kernel,
        out_shape=jax.ShapeDtypeStruct((B, H, S, dh), out_dtype),
        grid=grid,
        in_specs=[
            pl.BlockSpec((1, ts, D), lambda b, si, h: (b, si, 0)),
            pl.BlockSpec((1, D, dh), lambda b, si, h: (h, 0, 0)),
            pl.BlockSpec((1, 1, dh), lambda b, si, h: (h, 0, 0)),
        ],
        out_specs=pl.BlockSpec((1, 1, ts, dh), lambda b, si, h: (b, h, si, 0)),
        compiler_params=pltpu.CompilerParams(
            dimension_semantics=("parallel", "parallel", "arbitrary"),
            vmem_limit_bytes=_VMEM_LIMIT,
        ),
        cost_estimate=cost,
    )(x, w_h, b_h)


# ----------------------------------------------------------------------------
# Fused value projection:  ((x @ Wr + br) @ Wl + bl)  -> (B, H, S, dvh)
# ----------------------------------------------------------------------------
def _fused_value_kernel(x_ref, wr_ref, br_ref, wl_ref, bl_ref, o_ref, *,
                        num_heads):
    # x: (1, ts, D)  wr: (D, Dz)  br: (1, Dz)  wl: (H, Dz, dvh)  bl: (H, 1, dvh)
    # o: (1, H, ts, dvh)
    h_mid = (jnp.dot(x_ref[0], wr_ref[...],
                     preferred_element_type=jnp.float32) + br_ref[...])
    h_mid = h_mid.astype(wl_ref.dtype)
    # Per-head second matmul written straight into its slot of the head-split
    # output block (no concatenate, bounded live ranges).
    for head in range(num_heads):
        o_ref[0, head] = (jnp.dot(h_mid, wl_ref[head],
                                  preferred_element_type=jnp.float32)
                          + bl_ref[head]).astype(o_ref.dtype)


def fused_value_proj(x, wr, br, wl_h, bl_h, *, ts_target=256, out_dtype=None):
    """Both compressed-value matmuls fused; head split folded into the output.

    x: (B, S, D) -> (B, H, S, dvh).  The (ts, Dz) intermediate never touches
    HBM; ts is capped so the x block + resident weights stay far below the
    v7x 64 MiB budget.
    """
    B, S, D = x.shape
    D2, Dz = wr.shape
    H, Dz2, dvh = wl_h.shape
    assert D == D2 and Dz == Dz2
    if out_dtype is None:
        out_dtype = x.dtype
    ts = _pick_tile(S, ts_target, 8)
    grid = (B, S // ts)
    ib = jnp.dtype(x.dtype).itemsize
    ob = jnp.dtype(out_dtype).itemsize
    cost = pl.CostEstimate(
        flops=2 * B * S * Dz * (D + H * dvh),
        transcendentals=0,
        bytes_accessed=(B * S * D + D * Dz + H * Dz * dvh) * ib
                       + B * H * S * dvh * ob,
    )
    kernel = functools.partial(_fused_value_kernel, num_heads=H)
    return pl.pallas_call(
        kernel,
        out_shape=jax.ShapeDtypeStruct((B, H, S, dvh), out_dtype),
        grid=grid,
        in_specs=[
            pl.BlockSpec((1, ts, D), lambda b, si: (b, si, 0)),
            # Grid-invariant weights/biases: block index never changes, so the
            # pipeline fetches them once and does not re-DMA them.
            # TODO(synk): pipeline_mode=pl.Buffered(1) would also drop their
            # second VMEM buffer; skipped since they are only ~0.5 MiB here.
            pl.BlockSpec((D, Dz), lambda b, si: (0, 0)),
            pl.BlockSpec((1, Dz), lambda b, si: (0, 0)),
            pl.BlockSpec((H, Dz, dvh), lambda b, si: (0, 0, 0)),
            pl.BlockSpec((H, 1, dvh), lambda b, si: (0, 0, 0)),
        ],
        out_specs=pl.BlockSpec((1, H, ts, dvh), lambda b, si: (b, 0, si, 0)),
        compiler_params=pltpu.CompilerParams(
            dimension_semantics=("parallel", "parallel"),
            vmem_limit_bytes=_VMEM_LIMIT,
        ),
        cost_estimate=cost,
    )(x, wr, br, wl_h, bl_h)


# ----------------------------------------------------------------------------
# Flash attention: grid (B, H, Sq/tq, Sk/tk), online softmax, output (H,B,Sq,dvh)
# ----------------------------------------------------------------------------
def _flash_attn_kernel(q_ref, k_ref, v_ref, o_ref, m_sc, l_sc, acc_sc, *,
                       approx_recip):
    ki = pl.program_id(3)

    @pl.when(ki == 0)
    def _():
        m_sc[...] = jnp.full(m_sc.shape, -jnp.inf, m_sc.dtype)
        l_sc[...] = jnp.zeros_like(l_sc)
        acc_sc[...] = jnp.zeros_like(acc_sc)

    q = q_ref[0, 0]            # (tq, dqk)
    k = k_ref[0, 0]            # (tk, dqk)
    v = v_ref[0, 0]            # (tk, dvh)

    # NOTE: the PyTorch module does NOT scale scores by 1/sqrt(d_k); keep it.
    # K is consumed in stored layout (contract the last dims) -> no k.T.
    s = lax.dot_general(q, k, (((1,), (1,)), ((), ())),
                        preferred_element_type=jnp.float32)      # (tq, tk)

    m_prev = m_sc[...]
    m_new = jnp.maximum(m_prev, jnp.max(s, axis=-1, keepdims=True))
    alpha = jnp.exp(m_prev - m_new)
    p = jnp.exp(s - m_new)
    l_sc[...] = alpha * l_sc[...] + jnp.sum(p, axis=-1, keepdims=True)
    acc_sc[...] = alpha * acc_sc[...] + jnp.dot(
        p.astype(v.dtype), v, preferred_element_type=jnp.float32)
    m_sc[...] = m_new

    @pl.when(ki == pl.num_programs(3) - 1)
    def _():
        if approx_recip:
            inv_l = pl.reciprocal(l_sc[...], approx=True)   # EUP slot, ~free
        else:
            inv_l = 1.0 / l_sc[...]                         # exact (f32 check)
        o_ref[0, 0] = (acc_sc[...] * inv_l).astype(o_ref.dtype)


def flash_attention(q, k, v, *, tq_target=256, tk_target=512,
                    out_dtype=None, approx_recip=True):
    """q, k: (B, H, S, dqk), v: (B, H, S, dvh) -> (H, B, Sq, dvh).

    Flash-style online softmax with an Sk grid axis: per-step VMEM is O(tile),
    independent of sequence length, so the same tile plan fits v7x (64 MiB) as
    well as v5e/v6e.  B / H / Sq are 'parallel' axes -> real work for the
    second v7x TensorCore even at small batch.  The output is laid out
    (H, B, Sq, dvh) so PyTorch's `transpose(0,1).contiguous().view(B, Sq, -1)`
    head-merge is a free row-major reshape (output last dim == dvh, so the HBM
    write of each (tq, dvh) block is still fully contiguous even for dvh<128).
    """
    B, H, Sq, dqk = q.shape
    Sk = k.shape[2]
    dvh = v.shape[3]
    if out_dtype is None:
        out_dtype = q.dtype
    tq = _pick_tile(Sq, tq_target, 8)
    tk = _pick_tile(Sk, tk_target, 8)
    grid = (B, H, Sq // tq, Sk // tk)
    ib = jnp.dtype(q.dtype).itemsize
    ob = jnp.dtype(out_dtype).itemsize
    cost = pl.CostEstimate(
        flops=2 * B * H * Sq * Sk * (dqk + dvh),
        transcendentals=B * H * Sq * Sk,
        bytes_accessed=B * H * (Sq * dqk + (Sq // tq) * Sk * (dqk + dvh)) * ib
                       + B * H * Sq * dvh * ob,
    )
    kernel = functools.partial(_flash_attn_kernel, approx_recip=approx_recip)
    return pl.pallas_call(
        kernel,
        out_shape=jax.ShapeDtypeStruct((H, B, Sq, dvh), out_dtype),
        grid=grid,
        in_specs=[
            pl.BlockSpec((1, 1, tq, dqk), lambda b, h, qi, ki: (b, h, qi, 0)),
            pl.BlockSpec((1, 1, tk, dqk), lambda b, h, qi, ki: (b, h, ki, 0)),
            pl.BlockSpec((1, 1, tk, dvh), lambda b, h, qi, ki: (b, h, ki, 0)),
        ],
        out_specs=pl.BlockSpec((1, 1, tq, dvh),
                               lambda b, h, qi, ki: (h, b, qi, 0)),
        scratch_shapes=[
            pltpu.VMEM((tq, 1), jnp.float32),     # running max  m
            pltpu.VMEM((tq, 1), jnp.float32),     # running sum  l
            pltpu.VMEM((tq, dvh), jnp.float32),   # running PV accumulator
        ],
        compiler_params=pltpu.CompilerParams(
            dimension_semantics=("parallel", "parallel", "parallel",
                                 "arbitrary"),
            vmem_limit_bytes=_VMEM_LIMIT,
        ),
        cost_estimate=cost,
    )(q, k, v)


# ----------------------------------------------------------------------------
# Parameters (nn.Linear layout: weight (out, in)) + one-time kernel-layout prep
# ----------------------------------------------------------------------------
def init_params(key, d_model, q_k_zip_dim, v_zip_dim):
    def make_linear(k, in_dim, out_dim):
        kw, kb = jax.random.split(k)
        bound = 1.0 / np.sqrt(in_dim)
        w = jax.random.uniform(kw, (out_dim, in_dim), jnp.float32, -bound, bound)
        b = jax.random.uniform(kb, (out_dim,), jnp.float32, -bound, bound)
        return (w, b)

    k1, k2, k3, k4, k5 = jax.random.split(key, 5)
    return {
        "w_q": make_linear(k1, d_model, q_k_zip_dim),
        "w_k": make_linear(k2, d_model, q_k_zip_dim),
        "w_v_r": make_linear(k3, d_model, v_zip_dim),
        "w_v_l": make_linear(k4, v_zip_dim, d_model),
        "w_o": make_linear(k5, d_model, d_model),
    }


def prepare_params(params, num_heads, compute_dtype=jnp.float32):
    """One-time kernel-layout / dtype prep (NOT per forward):
      * transpose nn.Linear (out, in) weights to (in, out),
      * fold the head split of w_q / w_k / w_v_l into an (H, in, dh) layout,
      * cast weights to the compute dtype once; biases stay f32 (added to the
        f32 accumulator inside the kernels)."""
    H = num_heads
    cd = compute_dtype

    def plain(wb):
        w, b = wb
        return (jnp.asarray(w).T.astype(cd),
                jnp.asarray(b).reshape(1, -1).astype(jnp.float32))

    def head_split(wb):
        w, b = wb                                   # w: (H*dh, in), b: (H*dh,)
        out_dim, in_dim = w.shape
        dh = out_dim // H
        w_h = jnp.asarray(w).T.reshape(in_dim, H, dh).transpose(1, 0, 2)
        b_h = jnp.asarray(b).reshape(H, 1, dh)
        return (w_h.astype(cd), b_h.astype(jnp.float32))

    return {
        "w_q": head_split(params["w_q"]),
        "w_k": head_split(params["w_k"]),
        "w_v_r": plain(params["w_v_r"]),
        "w_v_l": head_split(params["w_v_l"]),
        "w_o": plain(params["w_o"]),
    }


# ----------------------------------------------------------------------------
# Forward pass (all hot paths in Pallas; intermediates in compute_dtype)
# ----------------------------------------------------------------------------
def mha_forward(prepped, q, k, v, *, num_heads, compute_dtype=jnp.float32,
                approx_recip=True, out_dtype=jnp.float32):
    B, Sq, D = q.shape
    H = num_heads
    cd = compute_dtype

    wq, bq = prepped["w_q"]
    wk, bk = prepped["w_k"]
    wvr, bvr = prepped["w_v_r"]
    wvl, bvl = prepped["w_v_l"]
    wo, bo = prepped["w_o"]

    # Projections write the head-split (B, H, S, dh) layout directly.
    query = linear_headsplit(q.astype(cd), wq, bq, out_dtype=cd)
    key = linear_headsplit(k.astype(cd), wk, bk, out_dtype=cd)
    value = fused_value_proj(v.astype(cd), wvr, bvr, wvl, bvl, out_dtype=cd)

    # Flash attention; output laid out (H, B, Sq, dvh).
    attn = flash_attention(query, key, value, out_dtype=cd,
                           approx_recip=approx_recip)

    dvh = value.shape[-1]
    # PyTorch: data.transpose(0, 1).contiguous().view(B, Sq, -1)
    # == row-major reinterpretation of the (H, B, Sq, dvh) buffer -> free.
    data2d = attn.reshape(B * Sq, H * dvh)

    out = linear(data2d, wo, bo, out_dtype=out_dtype)
    return out.reshape(B, Sq, D)


# ----------------------------------------------------------------------------
# Pure-JAX reference (mirrors the PyTorch forward op-by-op)
# ----------------------------------------------------------------------------
def reference_forward(params, q, k, v, num_heads):
    def lin(x, wb):
        w, b = wb
        return x @ w.T + b

    query = lin(q, params["w_q"])
    key = lin(k, params["w_k"])
    value = lin(lin(v, params["w_v_r"]), params["w_v_l"])
    B, Sq, _ = q.shape
    H = num_heads
    query = query.reshape(B, Sq, H, -1).transpose(0, 2, 1, 3)
    key = key.reshape(B, key.shape[1], H, -1).transpose(0, 2, 1, 3)
    value = value.reshape(B, value.shape[1], H, -1).transpose(0, 2, 1, 3)
    scores = jnp.einsum("bhqd,bhkd->bhqk", query, key)   # unscaled, per module
    scores = jax.nn.softmax(scores, axis=-1)
    data = jnp.einsum("bhqk,bhkd->bhqd", scores, value)
    data = jnp.transpose(data, (1, 0, 2, 3)).reshape(B, Sq, -1)
    return lin(data, params["w_o"])


# ----------------------------------------------------------------------------
if __name__ == "__main__":
    # small shapes consistent with the module's constraints
    d_model, num_heads, q_k_zip_dim, v_zip_dim = 32, 4, 16, 16
    B, S = 2, 8

    key = jax.random.PRNGKey(0)
    kp, kq, kk, kv = jax.random.split(key, 4)
    params = init_params(kp, d_model, q_k_zip_dim, v_zip_dim)

    q = jax.random.normal(kq, (B, S, d_model), jnp.float32)
    k = jax.random.normal(kk, (B, S, d_model), jnp.float32)
    v = jax.random.normal(kv, (B, S, d_model), jnp.float32)

    ref = reference_forward(params, q, k, v, num_heads)

    # 1) f32 + exact reciprocal: strict numerical check against the reference.
    prepped_f32 = prepare_params(params, num_heads, compute_dtype=jnp.float32)
    fwd_f32 = jax.jit(functools.partial(mha_forward, num_heads=num_heads,
                                        compute_dtype=jnp.float32,
                                        approx_recip=False))
    out_f32 = jax.block_until_ready(fwd_f32(prepped_f32, q, k, v))
    np.testing.assert_allclose(np.asarray(out_f32), np.asarray(ref),
                               rtol=1e-4, atol=1e-4)

    # 2) bf16 production mode (bf16 intermediates end-to-end, approx recip):
    #    validated at bf16-appropriate tolerance per the review's concern.
    prepped_bf16 = prepare_params(params, num_heads, compute_dtype=jnp.bfloat16)
    fwd_bf16 = jax.jit(functools.partial(mha_forward, num_heads=num_heads,
                                         compute_dtype=jnp.bfloat16,
                                         approx_recip=True))
    out_bf16 = jax.block_until_ready(fwd_bf16(prepped_bf16, q, k, v))
    np.testing.assert_allclose(np.asarray(out_bf16), np.asarray(ref),
                               rtol=5e-2, atol=5e-2)

    print("KERNEL_OK")
</pallas_src>

<mosaic_0001>
module attributes {stable_mosaic.version = 11 : i64} {
  func.func @_linear_headsplit_kernel(%arg0: i32, %arg1: i32, %arg2: i32, %arg3: memref<1x8x32xf32, #tpu.memory_space<vmem>>, %arg4: memref<1x32x4xf32, #tpu.memory_space<vmem>>, %arg5: memref<1x1x4xf32, #tpu.memory_space<vmem>>, %arg6: memref<1x1x8x4xf32, #tpu.memory_space<vmem>>) attributes {dimension_semantics = [#tpu.dimension_semantics<parallel>, #tpu.dimension_semantics<parallel>, #tpu.dimension_semantics<arbitrary>], iteration_bounds = array<i64: 2, 1, 4>, scalar_prefetch = 0 : i64, scratch_operands = 0 : i64, tpu.core_type = #tpu.core_type<tc>, window_params = [{transform_indices = @transform_0, window_bounds = array<i64: 1, 8, 32>}, {transform_indices = @transform_1, window_bounds = array<i64: 1, 32, 4>}, {transform_indices = @transform_2, window_bounds = array<i64: 1, 1, 4>}, {transform_indices = @transform_3, window_bounds = array<i64: 1, 1, 8, 4>}]} {
    %c0 = arith.constant 0 : index
    %c0_0 = arith.constant 0 : index
    %c0_1 = arith.constant 0 : index
    %0 = vector.load %arg3[%c0, %c0_0, %c0_1] : memref<1x8x32xf32, #tpu.memory_space<vmem>>, vector<1x8x32xf32>
    %1 = vector.shape_cast %0 : vector<1x8x32xf32> to vector<8x32xf32>
    %c0_2 = arith.constant 0 : index
    %c0_3 = arith.constant 0 : index
    %c0_4 = arith.constant 0 : index
    %2 = vector.load %arg4[%c0_2, %c0_3, %c0_4] : memref<1x32x4xf32, #tpu.memory_space<vmem>>, vector<1x32x4xf32>
    %3 = vector.shape_cast %2 : vector<1x32x4xf32> to vector<32x4xf32>
    %cst = arith.constant dense<0.000000e+00> : vector<8x4xf32>
    %4 = tpu.matmul %1, %3, %cst {dimension_numbers = #tpu.dot_dimension_numbers<[1], [0], [0], [1], [0, 0, 1, 1], [], []>} : vector<8x32xf32>, vector<32x4xf32>, vector<8x4xf32> -> vector<8x4xf32>
    %c0_5 = arith.constant 0 : index
    %c0_6 = arith.constant 0 : index
    %c0_7 = arith.constant 0 : index
    %5 = vector.load %arg5[%c0_5, %c0_6, %c0_7] : memref<1x1x4xf32, #tpu.memory_space<vmem>>, vector<1x1x4xf32>
    %6 = vector.shape_cast %5 : vector<1x1x4xf32> to vector<1x4xf32>
    %7 = vector.broadcast %6 : vector<1x4xf32> to vector<8x4xf32>
    %8 = arith.addf %4, %7 : vector<8x4xf32>
    %c0_8 = arith.constant 0 : index
    %c0_9 = arith.constant 0 : index
    %c0_10 = arith.constant 0 : index
    %c0_11 = arith.constant 0 : index
    %9 = vector.load %arg6[%c0_8, %c0_9, %c0_10, %c0_11] : memref<1x1x8x4xf32, #tpu.memory_space<vmem>>, vector<1x1x8x4xf32>
    %10 = vector.shape_cast %9 : vector<1x1x8x4xf32> to vector<8x4xf32>
    %11 = vector.shape_cast %8 : vector<8x4xf32> to vector<1x1x8x4xf32>
    tpu.vector_store %arg6[%c0_8, %c0_9, %c0_10, %c0_11], %11 {strides = array<i32>} : memref<1x1x8x4xf32, #tpu.memory_space<vmem>>, vector<1x1x8x4xf32>,
    return
  }
  func.func @transform_0(%arg0: i32, %arg1: i32, %arg2: i32) -> (i32, i32, i32) {
    %c0_i32 = arith.constant 0 : i32
    %c0_i32_0 = arith.constant 0 : i32
    return %arg0, %arg1, %c0_i32 : i32, i32, i32
  }
  func.func @transform_1(%arg0: i32, %arg1: i32, %arg2: i32) -> (i32, i32, i32) {
    %c0_i32 = arith.constant 0 : i32
    %c0_i32_0 = arith.constant 0 : i32
    %c0_i32_1 = arith.constant 0 : i32
    return %arg2, %c0_i32, %c0_i32_0 : i32, i32, i32
  }
  func.func @transform_2(%arg0: i32, %arg1: i32, %arg2: i32) -> (i32, i32, i32) {
    %c0_i32 = arith.constant 0 : i32
    %c0_i32_0 = arith.constant 0 : i32
    %c0_i32_1 = arith.constant 0 : i32
    return %arg2, %c0_i32, %c0_i32_0 : i32, i32, i32
  }
  func.func @transform_3(%arg0: i32, %arg1: i32, %arg2: i32) -> (i32, i32, i32, i32) {
    %c0_i32 = arith.constant 0 : i32
    %c0_i32_0 = arith.constant 0 : i32
    return %arg0, %arg2, %arg1, %c0_i32 : i32, i32, i32, i32
  }
}

module attributes {stable_mosaic.version = 11 : i64} {
  func.func @_fused_value_kernel(%arg0: i32, %arg1: i32, %arg2: memref<1x8x32xf32, #tpu.memory_space<vmem>>, %arg3: memref<32x16xf32, #tpu.memory_space<vmem>>, %arg4: memref<1x16xf32, #tpu.memory_space<vmem>>, %arg5: memref<4x16x8xf32, #tpu.memory_space<vmem>>, %arg6: memref<4x1x8xf32, #tpu.memory_space<vmem>>, %arg7: memref<1x4x8x8xf32, #tpu.memory_space<vmem>>) attributes {dimension_semantics = [#tpu.dimension_semantics<parallel>, #tpu.dimension_semantics<parallel>], iteration_bounds = array<i64: 2, 1>, scalar_prefetch = 0 : i64, scratch_operands = 0 : i64, tpu.core_type = #tpu.core_type<tc>, window_params = [{transform_indices = @transform_0, window_bounds = array<i64: 1, 8, 32>}, {pipeline_mode = #tpu.pipeline_mode<synchronous>, transform_indices = @transform_1, window_bounds = array<i64: 32, 16>}, {pipeline_mode = #tpu.pipeline_mode<synchronous>, transform_indices = @transform_2, window_bounds = array<i64: 1, 16>}, {pipeline_mode = #tpu.pipeline_mode<synchronous>, transform_indices = @transform_3, window_bounds = array<i64: 4, 16, 8>}, {pipeline_mode = #tpu.pipeline_mode<synchronous>, transform_indices = @transform_4, window_bounds = array<i64: 4, 1, 8>}, {transform_indices = @transform_5, window_bounds = array<i64: 1, 4, 8, 8>}]} {
    %c0 = arith.constant 0 : index
    %c0_0 = arith.constant 0 : index
    %c0_1 = arith.constant 0 : index
    %0 = vector.load %arg2[%c0, %c0_0, %c0_1] : memref<1x8x32xf32, #tpu.memory_space<vmem>>, vector<1x8x32xf32>
    %1 = vector.shape_cast %0 : vector<1x8x32xf32> to vector<8x32xf32>
    %c0_2 = arith.constant 0 : index
    %c0_3 = arith.constant 0 : index
    %2 = vector.load %arg3[%c0_2, %c0_3] : memref<32x16xf32, #tpu.memory_space<vmem>>, vector<32x16xf32>
    %cst = arith.constant dense<0.000000e+00> : vector<8x16xf32>
    %3 = tpu.matmul %1, %2, %cst {dimension_numbers = #tpu.dot_dimension_numbers<[1], [0], [0], [1], [0, 0, 1, 1], [], []>} : vector<8x32xf32>, vector<32x16xf32>, vector<8x16xf32> -> vector<8x16xf32>
    %c0_4 = arith.constant 0 : index
    %c0_5 = arith.constant 0 : index
    %4 = vector.load %arg4[%c0_4, %c0_5] : memref<1x16xf32, #tpu.memory_space<vmem>>, vector<1x16xf32>
    %5 = vector.broadcast %4 : vector<1x16xf32> to vector<8x16xf32>
    %6 = arith.addf %3, %5 : vector<8x16xf32>
    %c0_6 = arith.constant 0 : index
    %c0_7 = arith.constant 0 : index
    %c0_8 = arith.constant 0 : index
    %7 = vector.load %arg5[%c0_6, %c0_7, %c0_8] : memref<4x16x8xf32, #tpu.memory_space<vmem>>, vector<1x16x8xf32>
    %8 = vector.shape_cast %7 : vector<1x16x8xf32> to vector<16x8xf32>
    %cst_9 = arith.constant dense<0.000000e+00> : vector<8x8xf32>
    %9 = tpu.matmul %6, %8, %cst_9 {dimension_numbers = #tpu.dot_dimension_numbers<[1], [0], [0], [1], [0, 0, 1, 1], [], []>} : vector<8x16xf32>, vector<16x8xf32>, vector<8x8xf32> -> vector<8x8xf32>
    %c0_10 = arith.constant 0 : index
    %c0_11 = arith.constant 0 : index
    %c0_12 = arith.constant 0 : index
    %10 = vector.load %arg6[%c0_10, %c0_11, %c0_12] : memref<4x1x8xf32, #tpu.memory_space<vmem>>, vector<1x1x8xf32>
    %11 = vector.shape_cast %10 : vector<1x1x8xf32> to vector<1x8xf32>
    %12 = vector.broadcast %11 : vector<1x8xf32> to vector<8x8xf32>
    %13 = arith.addf %9, %12 : vector<8x8xf32>
    %c0_13 = arith.constant 0 : index
    %c0_14 = arith.constant 0 : index
    %c0_15 = arith.constant 0 : index
    %c0_16 = arith.constant 0 : index
    %14 = vector.load %arg7[%c0_13, %c0_14, %c0_15, %c0_16] : memref<1x4x8x8xf32, #tpu.memory_space<vmem>>, vector<1x1x8x8xf32>
    %15 = vector.shape_cast %14 : vector<1x1x8x8xf32> to vector<8x8xf32>
    %16 = vector.shape_cast %13 : vector<8x8xf32> to vector<1x1x8x8xf32>
    tpu.vector_store %arg7[%c0_13, %c0_14, %c0_15, %c0_16], %16 {strides = array<i32>} : memref<1x4x8x8xf32, #tpu.memory_space<vmem>>, vector<1x1x8x8xf32>,
    %c1 = arith.constant 1 : index
    %c0_17 = arith.constant 0 : index
    %c0_18 = arith.constant 0 : index
    %17 = vector.load %arg5[%c1, %c0_17, %c0_18] : memref<4x16x8xf32, #tpu.memory_space<vmem>>, vector<1x16x8xf32>
    %18 = vector.shape_cast %17 : vector<1x16x8xf32> to vector<16x8xf32>
    %cst_19 = arith.constant dense<0.000000e+00> : vector<8x8xf32>
    %19 = tpu.matmul %6, %18, %cst_19 {dimension_numbers = #tpu.dot_dimension_numbers<[1], [0], [0], [1], [0, 0, 1, 1], [], []>} : vector<8x16xf32>, vector<16x8xf32>, vector<8x8xf32> -> vector<8x8xf32>
    %c1_20 = arith.constant 1 : index
    %c0_21 = arith.constant 0 : index
    %c0_22 = arith.constant 0 : index
    %20 = vector.load %arg6[%c1_20, %c0_21, %c0_22] : memref<4x1x8xf32, #tpu.memory_space<vmem>>, vector<1x1x8xf32>
    %21 = vector.shape_cast %20 : vector<1x1x8xf32> to vector<1x8xf32>
    %22 = vector.broadcast %21 : vector<1x8xf32> to vector<8x8xf32>
    %23 = arith.addf %19, %22 : vector<8x8xf32>
    %c0_23 = arith.constant 0 : index
    %c1_24 = arith.constant 1 : index
    %c0_25 = arith.constant 0 : index
    %c0_26 = arith.constant 0 : index
    %24 = vector.load %arg7[%c0_23, %c1_24, %c0_25, %c0_26] : memref<1x4x8x8xf32, #tpu.memory_space<vmem>>, vector<1x1x8x8xf32>
    %25 = vector.shape_cast %24 : vector<1x1x8x8xf32> to vector<8x8xf32>
    %26 = vector.shape_cast %23 : vector<8x8xf32> to vector<1x1x8x8xf32>
    tpu.vector_store %arg7[%c0_23, %c1_24, %c0_25, %c0_26], %26 {strides = array<i32>} : memref<1x4x8x8xf32, #tpu.memory_space<vmem>>, vector<1x1x8x8xf32>,
    %c2 = arith.constant 2 : index
    %c0_27 = arith.constant 0 : index
    %c0_28 = arith.constant 0 : index
    %27 = vector.load %arg5[%c2, %c0_27, %c0_28] : memref<4x16x8xf32, #tpu.memory_space<vmem>>, vector<1x16x8xf32>
    %28 = vector.shape_cast %27 : vector<1x16x8xf32> to vector<16x8xf32>
    %cst_29 = arith.constant dense<0.000000e+00> : vector<8x8xf32>
    %29 = tpu.matmul %6, %28, %cst_29 {dimension_numbers = #tpu.dot_dimension_numbers<[1], [0], [0], [1], [0, 0, 1, 1], [], []>} : vector<8x16xf32>, vector<16x8xf32>, vector<8x8xf32> -> vector<8x8xf32>
    %c2_30 = arith.constant 2 : index
    %c0_31 = arith.constant 0 : index
    %c0_32 = arith.constant 0 : index
    %30 = vector.load %arg6[%c2_30, %c0_31, %c0_32] : memref<4x1x8xf32, #tpu.memory_space<vmem>>, vector<1x1x8xf32>
    %31 = vector.shape_cast %30 : vector<1x1x8xf32> to vector<1x8xf32>
    %32 = vector.broadcast %31 : vector<1x8xf32> to vector<8x8xf32>
    %33 = arith.addf %29, %32 : vector<8x8xf32>
    %c0_33 = arith.constant 0 : index
    %c2_34 = arith.constant 2 : index
    %c0_35 = arith.constant 0 : index
    %c0_36 = arith.constant 0 : index
    %34 = vector.load %arg7[%c0_33, %c2_34, %c0_35, %c0_36] : memref<1x4x8x8xf32, #tpu.memory_space<vmem>>, vector<1x1x8x8xf32>
    %35 = vector.shape_cast %34 : vector<1x1x8x8xf32> to vector<8x8xf32>
    %36 = vector.shape_cast %33 : vector<8x8xf32> to vector<1x1x8x8xf32>
    tpu.vector_store %arg7[%c0_33, %c2_34, %c0_35, %c0_36], %36 {strides = array<i32>} : memref<1x4x8x8xf32, #tpu.memory_space<vmem>>, vector<1x1x8x8xf32>,
    %c3 = arith.constant 3 : index
    %c0_37 = arith.constant 0 : index
    %c0_38 = arith.constant 0 : index
    %37 = vector.load %arg5[%c3, %c0_37, %c0_38] : memref<4x16x8xf32, #tpu.memory_space<vmem>>, vector<1x16x8xf32>
    %38 = vector.shape_cast %37 : vector<1x16x8xf32> to vector<16x8xf32>
    %cst_39 = arith.constant dense<0.000000e+00> : vector<8x8xf32>
    %39 = tpu.matmul %6, %38, %cst_39 {dimension_numbers = #tpu.dot_dimension_numbers<[1], [0], [0], [1], [0, 0, 1, 1], [], []>} : vector<8x16xf32>, vector<16x8xf32>, vector<8x8xf32> -> vector<8x8xf32>
    %c3_40 = arith.constant 3 : index
    %c0_41 = arith.constant 0 : index
    %c0_42 = arith.constant 0 : index
    %40 = vector.load %arg6[%c3_40, %c0_41, %c0_42] : memref<4x1x8xf32, #tpu.memory_space<vmem>>, vector<1x1x8xf32>
    %41 = vector.shape_cast %40 : vector<1x1x8xf32> to vector<1x8xf32>
    %42 = vector.broadcast %41 : vector<1x8xf32> to vector<8x8xf32>
    %43 = arith.addf %39, %42 : vector<8x8xf32>
    %c0_43 = arith.constant 0 : index
    %c3_44 = arith.constant 3 : index
    %c0_45 = arith.constant 0 : index
    %c0_46 = arith.constant 0 : index
    %44 = vector.load %arg7[%c0_43, %c3_44, %c0_45, %c0_46] : memref<1x4x8x8xf32, #tpu.memory_space<vmem>>, vector<1x1x8x8xf32>
    %45 = vector.shape_cast %44 : vector<1x1x8x8xf32> to vector<8x8xf32>
    %46 = vector.shape_cast %43 : vector<8x8xf32> to vector<1x1x8x8xf32>
    tpu.vector_store %arg7[%c0_43, %c3_44, %c0_45, %c0_46], %46 {strides = array<i32>} : memref<1x4x8x8xf32, #tpu.memory_space<vmem>>, vector<1x1x8x8xf32>,
    return
  }
  func.func @transform_0(%arg0: i32, %arg1: i32) -> (i32, i32, i32) {
    %c0_i32 = arith.constant 0 : i32
    %c0_i32_0 = arith.constant 0 : i32
    return %arg0, %arg1, %c0_i32 : i32, i32, i32
  }
  func.func @transform_1(%arg0: i32, %arg1: i32) -> (i32, i32) {
    %c0_i32 = arith.constant 0 : i32
    %c0_i32_0 = arith.constant 0 : i32
    %c0_i32_1 = arith.constant 0 : i32
    return %c0_i32, %c0_i32_0 : i32, i32
  }
  func.func @transform_2(%arg0: i32, %arg1: i32) -> (i32, i32) {
    %c0_i32 = arith.constant 0 : i32
    %c0_i32_0 = arith.constant 0 : i32
    %c0_i32_1 = arith.constant 0 : i32
    return %c0_i32, %c0_i32_0 : i32, i32
  }
  func.func @transform_3(%arg0: i32, %arg1: i32) -> (i32, i32, i32) {
    %c0_i32 = arith.constant 0 : i32
    %c0_i32_0 = arith.constant 0 : i32
    %c0_i32_1 = arith.constant 0 : i32
    %c0_i32_2 = arith.constant 0 : i32
    return %c0_i32, %c0_i32_0, %c0_i32_1 : i32, i32, i32
  }
  func.func @transform_4(%arg0: i32, %arg1: i32) -> (i32, i32, i32) {
    %c0_i32 = arith.constant 0 : i32
    %c0_i32_0 = arith.constant 0 : i32
    %c0_i32_1 = arith.constant 0 : i32
    %c0_i32_2 = arith.constant 0 : i32
    return %c0_i32, %c0_i32_0, %c0_i32_1 : i32, i32, i32
  }
  func.func @transform_5(%arg0: i32, %arg1: i32) -> (i32, i32, i32, i32) {
    %c0_i32 = arith.constant 0 : i32
    %c0_i32_0 = arith.constant 0 : i32
    %c0_i32_1 = arith.constant 0 : i32
    return %arg0, %c0_i32, %arg1, %c0_i32_0 : i32, i32, i32, i32
  }
}

module attributes {stable_mosaic.version = 11 : i64} {
  func.func @_flash_attn_kernel(%arg0: i32, %arg1: i32, %arg2: i32, %arg3: i32, %arg4: memref<1x1x8x4xf32, #tpu.memory_space<vmem>>, %arg5: memref<1x1x8x4xf32, #tpu.memory_space<vmem>>, %arg6: memref<1x1x8x8xf32, #tpu.memory_space<vmem>>, %arg7: memref<1x1x8x8xf32, #tpu.memory_space<vmem>>, %arg8: memref<8x1xf32, #tpu.memory_space<vmem>>, %arg9: memref<8x1xf32, #tpu.memory_space<vmem>>, %arg10: memref<8x8xf32, #tpu.memory_space<vmem>>) attributes {dimension_semantics = [#tpu.dimension_semantics<parallel>, #tpu.dimension_semantics<parallel>, #tpu.dimension_semantics<parallel>, #tpu.dimension_semantics<arbitrary>], iteration_bounds = array<i64: 2, 4, 1, 1>, scalar_prefetch = 0 : i64, scratch_operands = 3 : i64, tpu.core_type = #tpu.core_type<tc>, window_params = [{transform_indices = @transform_0, window_bounds = array<i64: 1, 1, 8, 4>}, {transform_indices = @transform_1, window_bounds = array<i64: 1, 1, 8, 4>}, {transform_indices = @transform_2, window_bounds = array<i64: 1, 1, 8, 8>}, {transform_indices = @transform_3, window_bounds = array<i64: 1, 1, 8, 8>}]} {
    %c0_i32 = arith.constant 0 : i32
    %0 = arith.cmpi eq, %arg3, %c0_i32 : i32
    %1 = arith.extui %0 : i1 to i32
    %c0_i32_0 = arith.constant 0 : i32
    %2 = arith.cmpi ne, %1, %c0_i32_0 : i32
    scf.if %2 {
      %cst_29 = arith.constant 0xFF800000 : f32
      %35 = vector.broadcast %cst_29 : f32 to vector<8x1xf32>
      %c0_30 = arith.constant 0 : index
      %c0_31 = arith.constant 0 : index
      %36 = vector.load %arg8[%c0_30, %c0_31] : memref<8x1xf32, #tpu.memory_space<vmem>>, vector<8x1xf32>
      tpu.vector_store %arg8[%c0_30, %c0_31], %35 {strides = array<i32>} : memref<8x1xf32, #tpu.memory_space<vmem>>, vector<8x1xf32>,
      %cst_32 = arith.constant 0.000000e+00 : f32
      %37 = vector.broadcast %cst_32 : f32 to vector<8x1xf32>
      %c0_33 = arith.constant 0 : index
      %c0_34 = arith.constant 0 : index
      %38 = vector.load %arg9[%c0_33, %c0_34] : memref<8x1xf32, #tpu.memory_space<vmem>>, vector<8x1xf32>
      tpu.vector_store %arg9[%c0_33, %c0_34], %37 {strides = array<i32>} : memref<8x1xf32, #tpu.memory_space<vmem>>, vector<8x1xf32>,
      %cst_35 = arith.constant 0.000000e+00 : f32
      %39 = vector.broadcast %cst_35 : f32 to vector<8x8xf32>
      %c0_36 = arith.constant 0 : index
      %c0_37 = arith.constant 0 : index
      %40 = vector.load %arg10[%c0_36, %c0_37] : memref<8x8xf32, #tpu.memory_space<vmem>>, vector<8x8xf32>
      tpu.vector_store %arg10[%c0_36, %c0_37], %39 {strides = array<i32>} : memref<8x8xf32, #tpu.memory_space<vmem>>, vector<8x8xf32>,
    } else {
    }
    %c0 = arith.constant 0 : index
    %c0_1 = arith.constant 0 : index
    %c0_2 = arith.constant 0 : index
    %c0_3 = arith.constant 0 : index
    %3 = vector.load %arg4[%c0, %c0_1, %c0_2, %c0_3] : memref<1x1x8x4xf32, #tpu.memory_space<vmem>>, vector<1x1x8x4xf32>
    %4 = vector.shape_cast %3 : vector<1x1x8x4xf32> to vector<8x4xf32>
    %c0_4 = arith.constant 0 : index
    %c0_5 = arith.constant 0 : index
    %c0_6 = arith.constant 0 : index
    %c0_7 = arith.constant 0 : index
    %5 = vector.load %arg5[%c0_4, %c0_5, %c0_6, %c0_7] : memref<1x1x8x4xf32, #tpu.memory_space<vmem>>, vector<1x1x8x4xf32>
    %6 = vector.shape_cast %5 : vector<1x1x8x4xf32> to vector<8x4xf32>
    %c0_8 = arith.constant 0 : index
    %c0_9 = arith.constant 0 : index
    %c0_10 = arith.constant 0 : index
    %c0_11 = arith.constant 0 : index
    %7 = vector.load %arg6[%c0_8, %c0_9, %c0_10, %c0_11] : memref<1x1x8x8xf32, #tpu.memory_space<vmem>>, vector<1x1x8x8xf32>
    %8 = vector.shape_cast %7 : vector<1x1x8x8xf32> to vector<8x8xf32>
    %cst = arith.constant dense<0.000000e+00> : vector<8x8xf32>
    %9 = tpu.matmul %4, %6, %cst {dimension_numbers = #tpu.dot_dimension_numbers<[1], [1], [0], [0], [0, 0, 1, 0], [], []>} : vector<8x4xf32>, vector<8x4xf32>, vector<8x8xf32> -> vector<8x8xf32>
    %c0_12 = arith.constant 0 : index
    %c0_13 = arith.constant 0 : index
    %10 = vector.load %arg8[%c0_12, %c0_13] : memref<8x1xf32, #tpu.memory_space<vmem>>, vector<8x1xf32>
    %cst_14 = arith.constant dense<0xFF800000> : vector<8xf32>
    %11 = vector.multi_reduction <maximumf>, %9, %cst_14 [1] : vector<8x8xf32> to vector<8xf32>
    %12 = vector.shape_cast %11 : vector<8xf32> to vector<8x1xf32>
    %13 = arith.maximumf %10, %12 : vector<8x1xf32>
    %14 = arith.subf %10, %13 : vector<8x1xf32>
    %15 = math.exp %14 : vector<8x1xf32>
    %16 = vector.broadcast %13 : vector<8x1xf32> to vector<8x8xf32>
    %17 = arith.subf %9, %16 : vector<8x8xf32>
    %18 = math.exp %17 : vector<8x8xf32>
    %c0_15 = arith.constant 0 : index
    %c0_16 = arith.constant 0 : index
    %19 = vector.load %arg9[%c0_15, %c0_16] : memref<8x1xf32, #tpu.memory_space<vmem>>, vector<8x1xf32>
    %20 = arith.mulf %15, %19 : vector<8x1xf32>
    %cst_17 = arith.constant dense<0.000000e+00> : vector<8xf32>
    %21 = vector.multi_reduction <add>, %18, %cst_17 [1] : vector<8x8xf32> to vector<8xf32>
    %22 = vector.shape_cast %21 : vector<8xf32> to vector<8x1xf32>
    %23 = arith.addf %20, %22 : vector<8x1xf32>
    %c0_18 = arith.constant 0 : index
    %c0_19 = arith.constant 0 : index
    %24 = vector.load %arg9[%c0_18, %c0_19] : memref<8x1xf32, #tpu.memory_space<vmem>>, vector<8x1xf32>
    tpu.vector_store %arg9[%c0_18, %c0_19], %23 {strides = array<i32>} : memref<8x1xf32, #tpu.memory_space<vmem>>, vector<8x1xf32>,
    %c0_20 = arith.constant 0 : index
    %c0_21 = arith.constant 0 : index
    %25 = vector.load %arg10[%c0_20, %c0_21] : memref<8x8xf32, #tpu.memory_space<vmem>>, vector<8x8xf32>
    %26 = vector.broadcast %15 : vector<8x1xf32> to vector<8x8xf32>
    %27 = arith.mulf %26, %25 : vector<8x8xf32>
    %cst_22 = arith.constant dense<0.000000e+00> : vector<8x8xf32>
    %28 = tpu.matmul %18, %8, %cst_22 {dimension_numbers = #tpu.dot_dimension_numbers<[1], [0], [0], [1], [0, 0, 1, 1], [], []>} : vector<8x8xf32>, vector<8x8xf32>, vector<8x8xf32> -> vector<8x8xf32>
    %29 = arith.addf %27, %28 : vector<8x8xf32>
    %c0_23 = arith.constant 0 : index
    %c0_24 = arith.constant 0 : index
    %30 = vector.load %arg10[%c0_23, %c0_24] : memref<8x8xf32, #tpu.memory_space<vmem>>, vector<8x8xf32>
    tpu.vector_store %arg10[%c0_23, %c0_24], %29 {strides = array<i32>} : memref<8x8xf32, #tpu.memory_space<vmem>>, vector<8x8xf32>,
    %c0_25 = arith.constant 0 : index
    %c0_26 = arith.constant 0 : index
    %31 = vector.load %arg8[%c0_25, %c0_26] : memref<8x1xf32, #tpu.memory_space<vmem>>, vector<8x1xf32>
    tpu.vector_store %arg8[%c0_25, %c0_26], %13 {strides = array<i32>} : memref<8x1xf32, #tpu.memory_space<vmem>>, vector<8x1xf32>,
    %c0_i32_27 = arith.constant 0 : i32
    %32 = arith.cmpi eq, %arg3, %c0_i32_27 : i32
    %33 = arith.extui %32 : i1 to i32
    %c0_i32_28 = arith.constant 0 : i32
    %34 = arith.cmpi ne, %33, %c0_i32_28 : i32
    scf.if %34 {
      %c0_29 = arith.constant 0 : index
      %c0_30 = arith.constant 0 : index
      %35 = vector.load %arg9[%c0_29, %c0_30] : memref<8x1xf32, #tpu.memory_space<vmem>>, vector<8x1xf32>
      %cst_31 = arith.constant 1.000000e+00 : f32
      %36 = vector.broadcast %cst_31 : f32 to vector<8x1xf32>
      %37 = arith.divf %36, %35 : vector<8x1xf32>
      %c0_32 = arith.constant 0 : index
      %c0_33 = arith.constant 0 : index
      %38 = vector.load %arg10[%c0_32, %c0_33] : memref<8x8xf32, #tpu.memory_space<vmem>>, vector<8x8xf32>
      %39 = vector.broadcast %37 : vector<8x1xf32> to vector<8x8xf32>
      %40 = arith.mulf %38, %39 : vector<8x8xf32>
      %c0_34 = arith.constant 0 : index
      %c0_35 = arith.constant 0 : index
      %c0_36 = arith.constant 0 : index
      %c0_37 = arith.constant 0 : index
      %41 = vector.load %arg7[%c0_34, %c0_35, %c0_36, %c0_37] : memref<1x1x8x8xf32, #tpu.memory_space<vmem>>, vector<1x1x8x8xf32>
      %42 = vector.shape_cast %41 : vector<1x1x8x8xf32> to vector<8x8xf32>
      %43 = vector.shape_cast %40 : vector<8x8xf32> to vector<1x1x8x8xf32>
      tpu.vector_store %arg7[%c0_34, %c0_35, %c0_36, %c0_37], %43 {strides = array<i32>} : memref<1x1x8x8xf32, #tpu.memory_space<vmem>>, vector<1x1x8x8xf32>,
    } else {
    }
    return
  }
  func.func @transform_0(%arg0: i32, %arg1: i32, %arg2: i32, %arg3: i32) -> (i32, i32, i32, i32) {
    %c0_i32 = arith.constant 0 : i32
    %c0_i32_0 = arith.constant 0 : i32
    return %arg0, %arg1, %arg2, %c0_i32 : i32, i32, i32, i32
  }
  func.func @transform_1(%arg0: i32, %arg1: i32, %arg2: i32, %arg3: i32) -> (i32, i32, i32, i32) {
    %c0_i32 = arith.constant 0 : i32
    %c0_i32_0 = arith.constant 0 : i32
    return %arg0, %arg1, %arg3, %c0_i32 : i32, i32, i32, i32
  }
  func.func @transform_2(%arg0: i32, %arg1: i32, %arg2: i32, %arg3: i32) -> (i32, i32, i32, i32) {
    %c0_i32 = arith.constant 0 : i32
    %c0_i32_0 = arith.constant 0 : i32
    return %arg0, %arg1, %arg3, %c0_i32 : i32, i32, i32, i32
  }
  func.func @transform_3(%arg0: i32, %arg1: i32, %arg2: i32, %arg3: i32) -> (i32, i32, i32, i32) {
    %c0_i32 = arith.constant 0 : i32
    %c0_i32_0 = arith.constant 0 : i32
    return %arg1, %arg0, %arg2, %c0_i32 : i32, i32, i32, i32
  }
}

module attributes {stable_mosaic.version = 11 : i64} {
  func.func @_linear_kernel(%arg0: i32, %arg1: i32, %arg2: i32, %arg3: memref<16x32xf32, #tpu.memory_space<vmem>>, %arg4: memref<32x32xf32, #tpu.memory_space<vmem>>, %arg5: memref<1x32xf32, #tpu.memory_space<vmem>>, %arg6: memref<16x32xf32, #tpu.memory_space<vmem>>, %arg7: memref<16x32xf32, #tpu.memory_space<vmem>>) attributes {dimension_semantics = [#tpu.dimension_semantics<parallel>, #tpu.dimension_semantics<parallel>, #tpu.dimension_semantics<arbitrary>], iteration_bounds = array<i64: 1, 1, 1>, scalar_prefetch = 0 : i64, scratch_operands = 1 : i64, tpu.core_type = #tpu.core_type<tc>, window_params = [{transform_indices = @transform_0, window_bounds = array<i64: 16, 32>}, {transform_indices = @transform_1, window_bounds = array<i64: 32, 32>}, {transform_indices = @transform_2, window_bounds = array<i64: 1, 32>}, {transform_indices = @transform_3, window_bounds = array<i64: 16, 32>}]} {
    %c0_i32 = arith.constant 0 : i32
    %0 = arith.cmpi eq, %arg2, %c0_i32 : i32
    %1 = arith.extui %0 : i1 to i32
    %c0_i32_0 = arith.constant 0 : i32
    %2 = arith.cmpi ne, %1, %c0_i32_0 : i32
    scf.if %2 {
      %cst_10 = arith.constant 0.000000e+00 : f32
      %12 = vector.broadcast %cst_10 : f32 to vector<16x32xf32>
      %c0_11 = arith.constant 0 : index
      %c0_12 = arith.constant 0 : index
      %13 = vector.load %arg7[%c0_11, %c0_12] : memref<16x32xf32, #tpu.memory_space<vmem>>, vector<16x32xf32>
      tpu.vector_store %arg7[%c0_11, %c0_12], %12 {strides = array<i32>} : memref<16x32xf32, #tpu.memory_space<vmem>>, vector<16x32xf32>,
    } else {
    }
    %c0 = arith.constant 0 : index
    %c0_1 = arith.constant 0 : index
    %3 = vector.load %arg7[%c0, %c0_1] : memref<16x32xf32, #tpu.memory_space<vmem>>, vector<16x32xf32>
    %c0_2 = arith.constant 0 : index
    %c0_3 = arith.constant 0 : index
    %4 = vector.load %arg3[%c0_2, %c0_3] : memref<16x32xf32, #tpu.memory_space<vmem>>, vector<16x32xf32>
    %c0_4 = arith.constant 0 : index
    %c0_5 = arith.constant 0 : index
    %5 = vector.load %arg4[%c0_4, %c0_5] : memref<32x32xf32, #tpu.memory_space<vmem>>, vector<32x32xf32>
    %cst = arith.constant dense<0.000000e+00> : vector<16x32xf32>
    %6 = tpu.matmul %4, %5, %cst {dimension_numbers = #tpu.dot_dimension_numbers<[1], [0], [0], [1], [0, 0, 1, 1], [], []>} : vector<16x32xf32>, vector<32x32xf32>, vector<16x32xf32> -> vector<16x32xf32>
    %7 = arith.addf %3, %6 : vector<16x32xf32>
    %c0_6 = arith.constant 0 : index
    %c0_7 = arith.constant 0 : index
    %8 = vector.load %arg7[%c0_6, %c0_7] : memref<16x32xf32, #tpu.memory_space<vmem>>, vector<16x32xf32>
    tpu.vector_store %arg7[%c0_6, %c0_7], %7 {strides = array<i32>} : memref<16x32xf32, #tpu.memory_space<vmem>>, vector<16x32xf32>,
    %c0_i32_8 = arith.constant 0 : i32
    %9 = arith.cmpi eq, %arg2, %c0_i32_8 : i32
    %10 = arith.extui %9 : i1 to i32
    %c0_i32_9 = arith.constant 0 : i32
    %11 = arith.cmpi ne, %10, %c0_i32_9 : i32
    scf.if %11 {
      %c0_10 = arith.constant 0 : index
      %c0_11 = arith.constant 0 : index
      %12 = vector.load %arg7[%c0_10, %c0_11] : memref<16x32xf32, #tpu.memory_space<vmem>>, vector<16x32xf32>
      %c0_12 = arith.constant 0 : index
      %c0_13 = arith.constant 0 : index
      %13 = vector.load %arg5[%c0_12, %c0_13] : memref<1x32xf32, #tpu.memory_space<vmem>>, vector<1x32xf32>
      %14 = vector.broadcast %13 : vector<1x32xf32> to vector<16x32xf32>
      %15 = arith.addf %12, %14 : vector<16x32xf32>
      %c0_14 = arith.constant 0 : index
      %c0_15 = arith.constant 0 : index
      %16 = vector.load %arg6[%c0_14, %c0_15] : memref<16x32xf32, #tpu.memory_space<vmem>>, vector<16x32xf32>
      tpu.vector_store %arg6[%c0_14, %c0_15], %15 {strides = array<i32>} : memref<16x32xf32, #tpu.memory_space<vmem>>, vector<16x32xf32>,
    } else {
    }
    return
  }
  func.func @transform_0(%arg0: i32, %arg1: i32, %arg2: i32) -> (i32, i32) {
    %c0_i32 = arith.constant 0 : i32
    return %arg0, %arg2 : i32, i32
  }
  func.func @transform_1(%arg0: i32, %arg1: i32, %arg2: i32) -> (i32, i32) {
    %c0_i32 = arith.constant 0 : i32
    return %arg2, %arg1 : i32, i32
  }
  func.func @transform_2(%arg0: i32, %arg1: i32, %arg2: i32) -> (i32, i32) {
    %c0_i32 = arith.constant 0 : i32
    %c0_i32_0 = arith.constant 0 : i32
    return %c0_i32, %arg1 : i32, i32
  }
  func.func @transform_3(%arg0: i32, %arg1: i32, %arg2: i32) -> (i32, i32) {
    %c0_i32 = arith.constant 0 : i32
    return %arg0, %arg1 : i32, i32
  }
}

</mosaic_0001>

<bundles_post_ra>
// kernel: mha_forward.5
= control target key start
LH: loop header
LB: loop body
LE: loop exit
PB: predicated region body
PF: predicated region fallthrough
CT: control target
= control target key end

     0   :  { %s588_s12 = smov 0   ;;  %s590_s13 = smov 0   ;;  %s645_s0 = inlined_call_operand.vmem [shape: f32[2,8,32], index: 0, kind: input, shape index: {}]   ;;  %s646_s1 = inlined_call_operand.vmem [shape: f32[4,32,4], index: 1, kind: input, shape index: {}]   ;;  %s647_s2 = inlined_call_operand.vmem [shape: f32[4,1,4], index: 2, kind: input, shape index: {}]   ;;  %s648_s3 = inlined_call_operand.vmem [shape: f32[2,4,8,4], index: 3, kind: output, shape index: {}]  }
   0x1   :  { %s592_s14 = smov 0   ;;  %s594_s15 = smov 0  }
   0x2   :  { %s596_s16 = smov 0  }
   0x3 LB: > { %s25_s17 = sadd.s32 1, %s556_s14  ;;  %s32_s18 = sadd.s32 1, %s560_s15  ;;  %s564_s16 = sphi %s596_s16, %s13_s16   ;;  %s560_s15 = sphi %s594_s15, %s652_s15   ;;  %s556_s14 = sphi %s592_s14, %s651_s14   ;;  %s552_s13 = sphi %s590_s13, %s650_s13   ;;  %s548_s12 = sphi %s588_s12, %s649_s12  }
   0x4   : > { %p26_p0 = scmp.ge.s32.totalorder %s25_s17, 4  ;;  %p457_p1 = scmp.ge.s32.totalorder %s564_s16, 1 }
   0x5   : > { %p182_p2 = scmp.lt.s32.totalorder %s564_s16, 9 }
   0x6   : > { %s654_s17 = smov (%p26_p0, %s25_s17), 0  ;;  %s656_s18 = smov (!%p26_p0, %s32_s18), %s560_s15 }
   0x7   : > { %p183_p3 = pnand %p457_p1, %p182_p2  ;;  %p34_p4 = scmp.ge.s32.totalorder %s656_s18, 2 }
   0x8   : > { %p229_p5 = scmp.lt.s32.totalorder (!%p183_p3), %s548_s12, 3  ;;  %p222_p6 = scmp.lt.s32.totalorder (!%p183_p3), %s552_s13, 1 }
   0x9   : > { %s658_s18 = smov (%p34_p4, %s656_s18), 0  ;;  %186 = sbr.rel (%p183_p3) target bundleno = 221 (0xdd), region = 32 }
   0xe   : > { %v566_v0 = vmov 0.0   ;;  %vm567_vm0 = vmmov 0   ;;  %s660_s12 = smov (!%p229_p5, %s548_s12), 3  ;;  %s662_s13 = smov (!%p222_p6, %s552_s13), 1  ;;  %vm260_vm1 = vcmask 261120   ;;  %vm334_vm2 = vcmask 31744  }
   0xf   : > { %473 = vmatprep.subr.mxu0 %v566_v0  ;;  %481 = vmatprep.mubr.msk.f32.mxu0 %vm567_vm0, %v566_v0  ;;  %s467_s19 = sshll.u32 %s660_s12, 5  ;;  %s458_s23 = sshll.u32 %s662_s13, 3 }
  0x10   : > { %s233_s22 = scalar_lea.vmem %s646_s1, %s467_s19  ;;  %s461_s24 = sshll.u32 %s662_s13, 2 }
  0x11   : > { %v252_v1 = vld [vmem:[%s233_s22 + $0x18] sm:$0xff]  ;;  %v251_v2 = vld [vmem:[%s233_s22 + $0x10] sm:$0xff]  ;;  %s245_s25 = sadd.s32 %s461_s24, %s660_s12  ;;  %v250_v3 = vld [vmem:[%s233_s22 + $0x8] sm:$0xff]  ;;  %s228_s28 = scalar_lea.vmem %s645_s0, %s458_s23 }
  0x12   : > { %474 = vmatpush3.msra.mxu0 %v252_v1  ;;  %v249_v4 = vld [vmem:[%s233_s22] sm:$0xff]  ;;  %s236_s4 = scalar_lea.vmem %s647_s2, %s660_s12  ;;  %s462_s5 = sshll.u32 %s245_s25, 3 }
  0x13   : > { %475 = vmatprep.subr.mxu0 %v566_v0  ;;  %v248_v5 = vld [vmem:[%s228_s28] sm:$0xff]  ;;  %s247_s8 = scalar_lea.vmem %s648_s3, %s462_s5 }
  0x14   : > { %476 = vmatpush3.msra.mxu0 %v251_v2  ;;  %v463_v6 = vld [vmem:[%s236_s4] ss:$0 sm:$0xff] }
  0x15   : > { %477 = vmatprep.subr.mxu0 %v566_v0 }
  0x16   : > { %478 = vmatpush3.msra.mxu0 %v250_v3 }
  0x17   : > { %479 = vmatprep.subr.mxu0 %v566_v0 }
  0x18   : > { %480 = vmatpush3.msra.mxu0 %v249_v4 }
  0x19   : > { %482 = vmatmul.mubr.msk.f32.vlgmr.msra.gmra.mxu0 %vm260_vm1, %v248_v5 }
  0xd9   : > { %v330_v7 = vpop.f32.mrf.mxu0 }
  0xda   : > { %v331_v8 = vadd.f32 %v463_v6, %v330_v7 }
  0xdb   : > { %v483_v9 = vpop.f32.mrf.mxu0 }
  0xdc   : > { %335 = vst.msk [vmem:[%s247_s8] sm:$0xff] %vm334_vm2, %v331_v8 }
  0xdd PF: > { %s13_s16 = sadd.s32 1, %s564_s16   ;;  %s649_s12 = smov %s556_s14 }
  0xde   : > { %p10_p7 = scmp.ge.s32.totalorder %s13_s16, 10   ;;  %s650_s13 = smov %s560_s15 }
  0xdf   : > { %s651_s14 = smov %s654_s17  ;;  %s652_s15 = smov %s658_s18 }
  0xe0   :  { %12 = sbr.rel (!%p10_p7) target bundleno = 3 (0x3), region = 68 }

// kernel: mha_forward.9
= control target key start
LH: loop header
LB: loop body
LE: loop exit
PB: predicated region body
PF: predicated region fallthrough
CT: control target
= control target key end

     0   :  { %vm19_vm0 = vcmask 261120   ;;  %v194_v3 = vmov 0.0   ;;  %s250_s0 = inlined_call_operand.vmem [shape: f32[16,32], index: 0, kind: input, shape index: {}]   ;;  %s251_s1 = inlined_call_operand.vmem [shape: f32[32,32], index: 1, kind: input, shape index: {}]   ;;  %s252_s2 = inlined_call_operand.vmem [shape: f32[1,32], index: 2, kind: input, shape index: {}]   ;;  %s253_s3 = inlined_call_operand.hbm [shape: f32[16,32], index: 3, kind: output, shape index: {}]  }
   0x1   :  { %v29_v0 = vld [vmem:[%s251_s1 + $0x18] sm:$0xff]  ;;  %v28_v1 = vld [vmem:[%s251_s1 + $0x10] sm:$0xff]  ;;  %v24_v2 = vld [vmem:[%s250_s0] sm:$0xff]  ;;  %21 = vst.msk [vmem:[#allocation2 + $0x8] sm:$0xff] %vm19_vm0, %v194_v3 }
   0x2   :  { %157 = vmatprep.subr.mxu0 %v29_v0  ;;  %20 = vst.msk [vmem:[#allocation2] sm:$0xff] %vm19_vm0, %v194_v3  ;;  %v27_v4 = vld [vmem:[%s251_s1 + $0x8] sm:$0xff]  ;;  %165 = vmatprep.mubr.msk.f32.mxu0 %vm19_vm0, %v24_v2 }
   0x3   :  { %158 = vmatpush3.msra.mxu0 %v29_v0 }
   0x4   :  { %8 = vsyncpa [#allocation4], 0  ;;  %159 = vmatprep.subr.mxu0 %v28_v1  ;;  %v26_v5 = vld [vmem:[%s251_s1] sm:$0xff]  ;;  %v25_v6 = vld [vmem:[%s250_s0 + $0x8] sm:$0xff]  ;;  %s195_s25 = smov [#allocation3]  }
   0x5   :  { %160 = vmatpush3.msra.mxu0 %v28_v1  ;;  %v150_v13 = vld [vmem:[%s252_s2] ss:$0 sm:$0xff]  ;;  %s137_s0 = sshll.u32 %s195_s25, 4  ;;  %s138_s0 = int_to_ptr.vmem [resolvable:$true] %s137_s0 }
   0x6   :  { %161 = vmatprep.subr.mxu0 %v27_v4  ;;  %s172_s26 = scalar_lea.vmem %s138_s0, 256  ;;  %p177_p1 = scmp.lt.s32.totalorder %s138_s0, %s138_s0 }
   0x7   :  { %162 = vmatpush3.msra.mxu0 %v27_v4  ;;  %p173_p0 = scmp.ne.s32.totalorder %s138_s0, %s172_s26  ;;  %p178_p2 = scmp.lt.s32.totalorder %s172_s26, %s172_s26 }
   0x8   :  { %163 = vmatprep.subr.mxu0 %v26_v5  ;;  %v23_v7 = vld [vmem:[#allocation2 + $0x8] sm:$0xff] }
   0x9   :  { %164 = vmatpush3.msra.mxu0 %v26_v5  ;;  %v22_v9 = vld [vmem:[#allocation2] sm:$0xff]  ;;  %p179_p3 = por %p178_p2, %p177_p1 }
   0xa   :  { %166 = vmatmul.mubr.msk.f32.vlgmr.msra.gmra.mxu0 %vm19_vm0, %v25_v6 }
   0xb   :  { %p180_p4 = pnand %p179_p3, %p173_p0 }
  0xca   :  { %v167_v8 = vpop.f32.mrf.mxu0 }
  0xcb   :  { %v113_v10 = vadd.f32 %v167_v8, %v23_v7 }
  0xcc   :  { %v103_v11 = vpop.f32.mrf.mxu0 }
  0xcd   :  { %115 = vst.msk [vmem:[#allocation2 + $0x8] sm:$0xff] %vm19_vm0, %v113_v10  ;;  %v112_v12 = vadd.f32 %v103_v11, %v22_v9 }
  0xcf   :  { %114 = vst.msk [vmem:[#allocation2] sm:$0xff] %vm19_vm0, %v112_v12 }
  0xd4   :  { %v120_v14 = vld [vmem:[#allocation2 + $0x8] sm:$0xff] }
  0xd5   :  { %v129_v15 = vadd.f32 %v150_v13, %v120_v14 }
  0xd6   :  { %v119_v16 = vld [vmem:[#allocation2] sm:$0xff] }
  0xd7   :  { %v128_v17 = vadd.f32 %v150_v13, %v119_v16  ;;  %131 = vst.msk [vmem:[#allocation3 + $0x8] sm:$0xff] %vm19_vm0, %v129_v15 }
  0xd9   :  { %130 = vst.msk [vmem:[#allocation3] sm:$0xff] %vm19_vm0, %v128_v17 }
  0xda   :  { %183 = shalt.err (!%p180_p4)
}
  0xdb   :  { %s196_s27 = smov 128   ;;  %s197_s2 = smov 8  }
  0xdc   :  { %143 = dma.vmem_to_hbm [thread:$0]  %s138_s0, 256, %s253_s3, [#allocation4], %s196_s27, %s196_s27, %s197_s2  }
  0xdd   :  { %192 = dma.done.wait [#allocation4], 256  }
  0xde   :  { %193 = vsyncadd [#allocation4], 4294967040 }
  0xdf   :  { %147 = vsyncpa [#allocation4], 1 }

// kernel: mha_forward.7
= control target key start
LH: loop header
LB: loop body
LE: loop exit
PB: predicated region body
PF: predicated region fallthrough
CT: control target
= control target key end

     0   :  { %s924_s18 = smov 0   ;;  %s926_s19 = smov 0   ;;  %s1025_s0 = inlined_call_operand.vmem [shape: f32[2,8,32], index: 0, kind: input, shape index: {}]   ;;  %s1026_s1 = inlined_call_operand.vmem [shape: f32[32,16], index: 1, kind: input, shape index: {}]   ;;  %s1027_s2 = inlined_call_operand.vmem [shape: f32[1,16], index: 2, kind: input, shape index: {}]   ;;  %s1028_s3 = inlined_call_operand.vmem [shape: f32[4,16,8], index: 3, kind: input, shape index: {}]   ;;  %s1029_s4 = inlined_call_operand.vmem [shape: f32[4,1,8], index: 4, kind: input, shape index: {}]   ;;  %s1030_s5 = inlined_call_operand.vmem [shape: f32[2,4,8,8], index: 5, kind: output, shape index: {}]  }
   0x1   :  { %s928_s20 = smov 0  }
   0x2 LB: > { %s27_s21 = sadd.s32 1, %s886_s19  ;;  %p757_p0 = scmp.ge.s32.totalorder %s890_s20, 1  ;;  %s890_s20 = sphi %s928_s20, %s15_s20   ;;  %s886_s19 = sphi %s926_s19, %s1032_s19   ;;  %s882_s18 = sphi %s924_s18, %s1031_s18  }
   0x3   : > { %p29_p1 = scmp.ge.s32.totalorder %s27_s21, 2  ;;  %p205_p2 = scmp.lt.s32.totalorder %s890_s20, 3 }
   0x5   : > { %s1034_s21 = smov (%p29_p1, %s27_s21), 0  ;;  %p206_p3 = pnand %p757_p0, %p205_p2 }
   0x6   : > { %p238_p4 = scmp.lt.s32.totalorder (!%p206_p3), %s882_s18, 1 }
   0x7   : > { %209 = sbr.rel (%p206_p3) target bundleno = 420 (0x1a4), region = 40 }
   0xc   : > { %v257_v0 = vld [vmem:[%s1026_s1 + $0x18] sm:$0xff]  ;;  %v892_v1 = vmov 0.0   ;;  %v256_v2 = vld [vmem:[%s1026_s1 + $0x10] sm:$0xff]  ;;  %vm893_vm0 = vmmov 0   ;;  %v340_v3 = vld [vmem:[%s1028_s3 + $0x8] sm:$0xff]  ;;  %s1036_s18 = smov (!%p238_p4, %s882_s18), 1 }
   0xd   : > { %803 = vmatprep.subr.mxu0 %v892_v1  ;;  %811 = vmatprep.mubr.msk.f32.mxu0 %vm893_vm0, %v892_v1  ;;  %v255_v4 = vld [vmem:[%s1026_s1 + $0x8] sm:$0xff]  ;;  %s758_s30 = sshll.u32 %s1036_s18, 3  ;;  %v254_v5 = vld [vmem:[%s1026_s1] sm:$0xff]  ;;  %vm265_vm1 = vcmask 261120   ;;  %vm348_vm2 = vcmask 130048   ;;  %v766_v13 = vld [vmem:[%s1028_s3 + $0x18] sm:$0xff] }
   0xe   : > { %804 = vmatpush3.msra.mxu0 %v257_v0  ;;  %814 = vmatprep.subr.mxu1 %v892_v1  ;;  %s244_s10 = scalar_lea.vmem %s1025_s0, %s758_s30  ;;  %v772_v7 = vld [vmem:[%s1028_s3 + $0x28] sm:$0xff]  ;;  %v339_v8 = vld [vmem:[%s1028_s3] sm:$0xff]  ;;  %v765_v15 = vld [vmem:[%s1028_s3 + $0x10] sm:$0xff]  ;;  %s785_s6 = sshll.u32 %s1036_s18, 5  ;;  %vm422_vm3 = vcmask 64512  }
   0xf   : > { %805 = vmatprep.subr.mxu0 %v892_v1  ;;  %815 = vmatpush3.msra.mxu1 %v340_v3  ;;  %v253_v6 = vld [vmem:[%s244_s10] sm:$0xff]  ;;  %v778_v16 = vld [vmem:[%s1028_s3 + $0x38] sm:$0xff]  ;;  %v777_v17 = vld [vmem:[%s1028_s3 + $0x30] sm:$0xff]  ;;  %s252_s13 = scalar_lea.vmem %s1030_s5, %s785_s6 }
  0x10   : > { %806 = vmatpush3.msra.mxu0 %v256_v2  ;;  %816 = vmatprep.subr.mxu1 %v892_v1  ;;  %v771_v9 = vld [vmem:[%s1028_s3 + $0x20] sm:$0xff] }
  0x11   : > { %807 = vmatprep.subr.mxu0 %v892_v1  ;;  %818 = vmatprep.mubr.msk.f32.mxu1 %vm893_vm0, %v892_v1  ;;  %v761_v10 = vld [vmem:[%s1027_s2] ss:$0 sm:$0xff]  ;;  %v774_v19 = vld [vmem:[%s1029_s4 + $0x2] ss:$0 sm:$0xff]  ;;  %v768_v26 = vld [vmem:[%s1029_s4 + $0x1] ss:$0 sm:$0xff] }
  0x12   : > { %808 = vmatpush3.msra.mxu0 %v255_v4  ;;  %817 = vmatpush3.msra.mxu1 %v339_v8  ;;  %v763_v18 = vld [vmem:[%s1029_s4] ss:$0 sm:$0xff]  ;;  %v780_v30 = vld [vmem:[%s1029_s4 + $0x3] ss:$0 sm:$0xff] }
  0x13   : > { %809 = vmatprep.subr.mxu0 %v892_v1  ;;  %821 = vmatprep.subr.mxu1 %v892_v1 }
  0x14   : > { %810 = vmatpush3.msra.mxu0 %v254_v5 }
  0x15   : > { %812 = vmatmul.mubr.msk.f32.vlgmr.msra.gmra.mxu0 %vm265_vm1, %v253_v6  ;;  %828 = vmatprep.subr.mxu0 %v892_v1 }
  0x16   : > { %832 = vmatprep.mubr.msk.f32.mxu0 %vm893_vm0, %v892_v1  ;;  %829 = vmatpush3.msra.mxu0 %v772_v7 }
  0x17   : > { %830 = vmatprep.subr.mxu0 %v892_v1 }
  0x18   : > { %831 = vmatpush3.msra.mxu0 %v771_v9 }
  0xd5   : > { %v335_v11 = vpop.f32.mrf.mxu0 }
  0xd6   : > { %v336_v12 = vadd.f32 %v761_v10, %v335_v11 }
  0xd7   : > { %v813_v14 = vpop.f32.mrf.mxu0 }
  0xd8   : > { %819 = vmatmul.mubr.msk.f32.vlgmr.msra.gmra.mxu1 %vm348_vm2, %v336_v12  ;;  %833 = vmatmul.mubr.msk.f32.vlgmr.msra.gmra.mxu0 %vm348_vm2, %v336_v12 }
  0xd9   : > { %822 = vmatpush3.msra.mxu1 %v766_v13  ;;  %825 = vmatprep.mubr.msk.f32.mxu1 %vm893_vm0, %v892_v1 }
  0xda   : > { %823 = vmatprep.subr.mxu1 %v892_v1 }
  0xdb   : > { %824 = vmatpush3.msra.mxu1 %v765_v15 }
  0xdc   : > { %835 = vmatprep.subr.mxu1 %v892_v1  ;;  %826 = vmatmul.mubr.msk.f32.vlgmr.msra.gmra.mxu1 %vm348_vm2, %v336_v12 }
  0xdd   : > { %836 = vmatpush3.msra.mxu1 %v778_v16  ;;  %839 = vmatprep.mubr.msk.f32.mxu1 %vm893_vm0, %v892_v1 }
  0xde   : > { %837 = vmatprep.subr.mxu1 %v892_v1 }
  0xdf   : > { %838 = vmatpush3.msra.mxu1 %v777_v17 }
  0xe0   : > { %840 = vmatmul.mubr.msk.f32.vlgmr.msra.gmra.mxu1 %vm348_vm2, %v336_v12 }
 0x198   : > { %v418_v20 = vpop.f32.mrf.mxu1  ;;  %v584_v21 = vpop.f32.mrf.mxu0 }
 0x199   : > { %v419_v22 = vadd.f32 %v763_v18, %v418_v20  ;;  %v585_v23 = vadd.f32 %v774_v19, %v584_v21 }
 0x19a   : > { %v820_v24 = vpop.f32.mrf.mxu1  ;;  %v834_v25 = vpop.f32.mrf.mxu0 }
 0x19b   : > { %423 = vst.msk [vmem:[%s252_s13] sm:$0xff] %vm422_vm3, %v419_v22  ;;  %776 = vst.msk [vmem:[%s252_s13 + $0x10] sm:$0xff] %vm422_vm3, %v585_v23 }
 0x19c   : > { %v501_v27 = vpop.f32.mrf.mxu1 }
 0x19d   : > { %v502_v28 = vadd.f32 %v768_v26, %v501_v27 }
 0x19e   : > { %v827_v29 = vpop.f32.mrf.mxu1 }
 0x19f   : > { %770 = vst.msk [vmem:[%s252_s13 + $0x8] sm:$0xff] %vm422_vm3, %v502_v28 }
 0x1a0   : > { %v667_v31 = vpop.f32.mrf.mxu1 }
 0x1a1   : > { %v668_v32 = vadd.f32 %v780_v30, %v667_v31 }
 0x1a2   : > { %v841_v33 = vpop.f32.mrf.mxu1 }
 0x1a3   : > { %782 = vst.msk [vmem:[%s252_s13 + $0x18] sm:$0xff] %vm422_vm3, %v668_v32 }
 0x1a4 PF: > { %s15_s20 = sadd.s32 1, %s890_s20   ;;  %s1031_s18 = smov %s886_s19 }
 0x1a5   : > { %p12_p5 = scmp.ge.s32.totalorder %s15_s20, 4   ;;  %s1032_s19 = smov %s1034_s21 }
 0x1a7   :  { %14 = sbr.rel (!%p12_p5) target bundleno = 2 (0x2), region = 79 }

// kernel: mha_forward.8
= control target key start
LH: loop header
LB: loop body
LE: loop exit
PB: predicated region body
PF: predicated region fallthrough
CT: control target
= control target key end

     0   :  { %s825_s12 = smov 0   ;;  %s827_s13 = smov 0   ;;  %s900_s0 = inlined_call_operand.vmem [shape: f32[2,4,8,4], index: 0, kind: input, shape index: {}]   ;;  %s901_s1 = inlined_call_operand.vmem [shape: f32[2,4,8,4], index: 1, kind: input, shape index: {}]   ;;  %s902_s2 = inlined_call_operand.vmem [shape: f32[2,4,8,8], index: 2, kind: input, shape index: {}]   ;;  %s903_s3 = inlined_call_operand.vmem [shape: f32[4,2,8,8], index: 3, kind: output, shape index: {}]  }
   0x1   :  { %s829_s14 = smov 0   ;;  %s831_s15 = smov 0  }
   0x2   :  { %s833_s16 = smov 0  }
   0x3 LB: > { %s35_s17 = sadd.s32 1, %s791_s14  ;;  %s39_s18 = sadd.s32 1, %s795_s15  ;;  %s799_s16 = sphi %s833_s16, %s13_s16   ;;  %s795_s15 = sphi %s831_s15, %s907_s15   ;;  %s791_s14 = sphi %s829_s14, %s906_s14   ;;  %s787_s13 = sphi %s827_s13, %s905_s13   ;;  %s783_s12 = sphi %s825_s12, %s904_s12  }
   0x4   : > { %p37_p0 = scmp.ge.s32.totalorder %s35_s17, 4  ;;  %p681_p1 = scmp.ge.s32.totalorder %s799_s16, 1 }
   0x5   : > { %p217_p2 = scmp.lt.s32.totalorder %s799_s16, 9 }
   0x6   : > { %s909_s17 = smov (%p37_p0, %s35_s17), 0  ;;  %s911_s18 = smov (!%p37_p0, %s39_s18), %s795_s15 }
   0x7   : > { %p218_p3 = pnand %p681_p1, %p217_p2  ;;  %p41_p4 = scmp.ge.s32.totalorder %s911_s18, 2 }
   0x8   : > { %p275_p5 = scmp.lt.s32.totalorder (!%p218_p3), %s787_s13, 1  ;;  %p277_p6 = scmp.lt.s32.totalorder (!%p218_p3), %s783_s12, 3 }
   0x9   : > { %s913_s18 = smov (%p41_p4, %s911_s18), 0  ;;  %221 = sbr.rel (%p218_p3) target bundleno = 789 (0x315), region = 32 }
   0xe   : > { %v801_v0 = vmov 0.0   ;;  %vm802_vm0 = vmmov 0   ;;  %s915_s13 = smov (!%p275_p5, %s787_s13), 1  ;;  %s917_s12 = smov (!%p277_p6, %s783_s12), 3  ;;  %vm331_vm1 = vcmask 31744   ;;  %vm326_vm2 = vcmask 64512  }
   0xf   : > { %699 = vmatprep.subr.mxu0 %v801_v0  ;;  %701 = vmatprep.mubr.msk.f32.mxu0 %vm802_vm0, %v801_v0  ;;  %s682_s19 = sshll.u32 %s915_s13, 2  ;;  %327 = vst.msk [vmem:[#allocation4] sm:$0xff] %vm326_vm2, %v801_v0  ;;  %vm323_vm3 = vcmask 7168   ;;  %v803_v3 = vmov -inf   ;;  %v804_v7 = vmov 0   ;;  %s688_s4 = sshll.u32 %s917_s12, 1 }
  0x10   : > { %704 = vmatprep.subr.mxu1 %v801_v0  ;;  %706 = vmatprep.mubr.msk.f32.mxu1 %vm802_vm0, %v801_v0  ;;  %s283_s20 = sadd.s32 %s682_s19, %s917_s12  ;;  %324 = vst.msk [vmem:[#allocation2] sm:$0xff] %vm323_vm3, %v803_v3  ;;  %325 = vst.msk [vmem:[#allocation3] sm:$0xff] %vm323_vm3, %v801_v0  ;;  %s316_s5 = sadd.s32 %s688_s4, %s915_s13 }
  0x11   : > { %s683_s21 = sshll.u32 %s283_s20, 3  ;;  %753 = vset.pattern.permute.xlu0 %v804_v7  ;;  %754 = vset.pattern.permute.xlu1 %v804_v7  ;;  %s689_s6 = sshll.u32 %s316_s5, 3 }
  0x12   : > { %s296_s24 = scalar_lea.vmem %s901_s1, %s683_s21  ;;  %s285_s27 = scalar_lea.vmem %s900_s0, %s683_s21 }
  0x13   : > { %v329_v1 = vld [vmem:[%s296_s24] sm:$0xff]  ;;  %s307_s30 = scalar_lea.vmem %s902_s2, %s683_s21  ;;  %s318_s9 = scalar_lea.vmem %s903_s3, %s689_s6 }
  0x14   : > { %700 = vmatpush3.xpose.msk.msra.mxu0 %vm331_vm1, %v329_v1  ;;  %v328_v2 = vld [vmem:[%s285_s27] sm:$0xff] }
  0x15   : > { %v330_v12 = vld [vmem:[%s307_s30] sm:$0xff] }
  0x16   : > { %705 = vmatpush3.msra.mxu1 %v330_v12  ;;  %v433_v26 = vld [vmem:[#allocation4] sm:$0xff] }
  0x17   : > { %702 = vmatmul.mubr.msk.f32.vlgmr.msra.gmra.mxu0 %vm331_vm1, %v328_v2  ;;  %v408_v8 = vld [vmem:[#allocation2] sm:$0xff]  ;;  %v425_v20 = vld [vmem:[#allocation3] sm:$0xff] }
  0xd7   : > { %v404_v4 = vpop.f32.mrf.mxu0 }
  0xd8   : > { %v410_v5 = vsel %vm326_vm2, %v404_v4, -inf }
  0xd9   : > { %411 = vmax.xlane.f32.xlu0 %v410_v5  ;;  %v703_v6 = vpop.f32.mrf.mxu0 }
 0x162   : > { %v412_v9 = vpop.xlane.xlu0 %411 }
 0x163   : > { %v413_v10 = vmax.f32 %v408_v8, %v412_v9 }
 0x165   : > { %v414_v11 = vsub.f32 %v408_v8, %v413_v10  ;;  %515 = vst.msk [vmem:[#allocation2] sm:$0xff] %vm323_vm3, %v413_v10  ;;  %419 = vperm.xlu0 %753, %v413_v10  }
 0x167   : > { %v415_v17 = vmul.f32 1.442695, %v414_v11 }
 0x1e0   : > { %v420_v13 = vpop.permute.xlu0 %419 }
 0x1e1   : > { %v422_v14 = vsub.f32 %v404_v4, %v420_v13 }
 0x1e3   : > { %v423_v15 = vmul.f32 1.442695, %v422_v14 }
 0x1e5   : > { %755 = vpow2.f32 %v423_v15 }
 0x1e6   : > { %757 = vpow2.f32 %v415_v17 }
 0x1f2   : > { %v756_v16 = vpop.eup %755 }
 0x1f3   : > { %707 = vmatmul.mubr.msk.f32.vlgmr.msra.gmra.mxu1 %vm326_vm2, %v756_v16  ;;  %v427_v18 = vsel %vm326_vm2, %v756_v16, 0.0  ;;  %v758_v19 = vpop.eup %757 }
 0x1f4   : > { %428 = vadd.xlane.f32.xlu1 %v427_v18  ;;  %v426_v21 = vmul.f32 %v758_v19, %v425_v20 }
 0x205   : > { %436 = vperm.xlu1 %754, %v758_v19  }
 0x27d   : > { %v429_v22 = vpop.xlane.xlu1 %428 }
 0x27e   : > { %v430_v23 = vadd.f32 %v429_v22, %v426_v21 }
 0x280   : > { %432 = vst.msk [vmem:[#allocation3] sm:$0xff] %vm323_vm3, %v430_v23 }
 0x281   : > { %v437_v27 = vpop.permute.xlu1 %436 }
 0x282   : > { %v439_v28 = vmul.f32 %v437_v27, %v433_v26 }
 0x287   : > { %v519_v24 = vld [vmem:[#allocation3] sm:$0xff] }
 0x288   : > { %759 = vrcp.f32 %v519_v24 }
 0x295   : > { %v760_v25 = vpop.eup %759 }
 0x296   : > { %525 = vperm.xlu1 %754, %v760_v25  }
 0x2b3   : > { %v509_v29 = vpop.f32.mrf.mxu1 }
 0x2b4   : > { %v513_v30 = vadd.f32 %v509_v29, %v439_v28 }
 0x2b5   : > { %v708_v31 = vpop.f32.mrf.mxu1 }
 0x2b6   : > { %514 = vst.msk [vmem:[#allocation4] sm:$0xff] %vm326_vm2, %v513_v30 }
 0x2bd   : > { %v522_v32 = vld [vmem:[#allocation4] sm:$0xff] }
 0x311   : > { %v526_v33 = vpop.permute.xlu1 %525 }
 0x312   : > { %v528_v34 = vmul.f32 %v526_v33, %v522_v32 }
 0x314   : > { %529 = vst.msk [vmem:[%s318_s9] sm:$0xff] %vm326_vm2, %v528_v34 }
 0x315 PF: > { %s13_s16 = sadd.s32 1, %s799_s16   ;;  %s904_s12 = smov %s791_s14 }
 0x316   : > { %p10_p7 = scmp.ge.s32.totalorder %s13_s16, 10   ;;  %s905_s13 = smov %s795_s15 }
 0x317   : > { %s906_s14 = smov %s909_s17  ;;  %s907_s15 = smov %s913_s18 }
 0x318   :  { %12 = sbr.rel (!%p10_p7) target bundleno = 3 (0x3), region = 76 }

</bundles_post_ra>
